<compile_context>
chip_gen: v7x
topology: tpu7x:2x2x1
jax: 0.10.0
libtpu: 0.0.40
codegen_flags: <defaults>
</compile_context>

<pallas_src>
import functools
import math

import jax
import jax.numpy as jnp
from jax.experimental import pallas as pl
from jax.experimental.pallas import tpu as pltpu

_MIB = 1024 * 1024


def _round_up(x: int, m: int) -> int:
    return ((x + m - 1) // m) * m


def _vmem_capacity_bytes() -> int:
    """Generation-aware physical VMEM (64 MiB/TC v7x, 128 MiB v5e/v6e)."""
    try:
        cap = int(getattr(pltpu.get_tpu_info(), "vmem_capacity_bytes", 0))
        if cap > 0:
            return cap
    except Exception:
        pass
    return 64 * _MIB  # conservative (v7x) fallback


def _swoosh_f32(xf, act_offset, act_const):
    """SwooshL/R in f32 with a numerically stable softplus."""
    x_off = xf - act_offset
    sp = jnp.where(x_off > 30.0, x_off,
                   jnp.log1p(jnp.exp(jnp.minimum(x_off, 30.0))))
    return sp - 0.08 * xf - act_const


# ----------------------------------------------------------------------------
# Kernels
# ----------------------------------------------------------------------------
def _fullN_kernel(x_ref, w_ref, b_ref, o_ref, acc_ref,
                  *, act_offset, act_const, precision):
    # x_ref: (tm, tk)  w_ref: (tk, Np)  b_ref: (1, Np)  o_ref/acc_ref: (tm, Np)
    k = pl.program_id(1)

    @pl.when(k == 0)
    def _init():
        acc_ref[...] = jnp.zeros_like(acc_ref)

    act = _swoosh_f32(x_ref[...].astype(jnp.float32), act_offset, act_const)
    acc_ref[...] += jnp.dot(act.astype(x_ref.dtype), w_ref[...],
                            preferred_element_type=jnp.float32,
                            precision=precision)

    @pl.when(k == pl.num_programs(1) - 1)
    def _finalize():
        o_ref[...] = (acc_ref[...] + b_ref[...].astype(jnp.float32)
                      ).astype(o_ref.dtype)


def _tiledN_kernel(x_ref, w_ref, b_ref, o_ref, acc_ref, act_ref,
                   *, act_offset, act_const, precision):
    # x_ref: (tm, tk)  w_ref: (tk, tn)  b_ref: (1, tn)  o_ref/acc_ref: (tm, tn)
    # act_ref: (num_k, tm, tk) VMEM activation cache (filled at j==0)
    j = pl.program_id(1)
    k = pl.program_id(2)

    @pl.when(k == 0)
    def _init():
        acc_ref[...] = jnp.zeros_like(acc_ref)

    @pl.when(j == 0)
    def _activate():
        act = _swoosh_f32(x_ref[...].astype(jnp.float32), act_offset, act_const)
        act_ref[k] = act.astype(act_ref.dtype)

    acc_ref[...] += jnp.dot(act_ref[k], w_ref[...],
                            preferred_element_type=jnp.float32,
                            precision=precision)

    @pl.when(k == pl.num_programs(2) - 1)
    def _finalize():
        o_ref[...] = (acc_ref[...] + b_ref[...].astype(jnp.float32)
                      ).astype(o_ref.dtype)


# ----------------------------------------------------------------------------
# Wrapper
# ----------------------------------------------------------------------------
def activation_dropout_and_linear(x, weight_t, bias, activation: str = "SwooshL",
                                  out_channels=None, precision=None,
                                  _force_tiles=None):
    """Forward pass of ActivationDropoutAndLinear.

    x:         (..., in_channels)
    weight_t:  (Kp, Np) -- the nn.Linear weight, pre-transposed (and optionally
               pre-padded to 128-multiples) ONCE at init time (see init_params).
    bias:      (Np,) (optionally pre-padded)
    out_channels: true output width (defaults to bias.shape[-1], i.e. unpadded).
    precision: MXU precision for the dot (None -> HIGHEST for f32 inputs,
               native bf16 otherwise). Pass jax.lax.Precision.HIGH/DEFAULT for
               more MXU throughput with f32 inputs.
    returns    (..., out_channels) == SwooshX(x) @ weight_t + bias
    """
    if activation == "SwooshL":
        act_offset, act_const = 4.0, 0.035
    elif activation == "SwooshR":
        act_offset, act_const = 1.0, 0.313261687
    else:
        raise ValueError(f"unsupported activation: {activation}")

    in_channels = x.shape[-1]
    kp_w, np_w = weight_t.shape
    if out_channels is None:
        out_channels = bias.shape[-1]
    lead_shape = x.shape[:-1]
    m = int(math.prod(lead_shape)) if lead_shape else 1
    out_dtype = x.dtype

    if m == 0:  # empty input guard
        return jnp.zeros((*lead_shape, out_channels), out_dtype)

    # Padded problem dims (weights from init_params are already padded; pad
    # here only if the caller handed us raw, unaligned parameters).
    kp = _round_up(kp_w, 128)
    np_ = _round_up(np_w, 128)
    if (kp, np_) != (kp_w, np_w):
        weight_t = jnp.pad(weight_t, ((0, kp - kp_w), (0, np_ - np_w)))
    b2d = bias.reshape(1, -1)
    if b2d.shape[1] != np_:
        b2d = jnp.pad(b2d, ((0, 0), (0, np_ - b2d.shape[1])))

    xsz = jnp.dtype(x.dtype).itemsize
    wsz = jnp.dtype(weight_t.dtype).itemsize
    bsz = jnp.dtype(b2d.dtype).itemsize

    if precision is None and jnp.dtype(x.dtype) == jnp.float32:
        precision = jax.lax.Precision.HIGHEST

    # ---------------- generation-aware VMEM budget ----------------
    vmem_cap = _vmem_capacity_bytes()
    budget = int(0.80 * vmem_cap)

    def _divisor_tiles(dim_p):
        return [t for t in (512, 256, 128) if dim_p % t == 0] or [128]

    def _tm_candidates():
        if m < 256:
            return [_round_up(m, 16)]
        # Big row tiles halve weight re-streaming on 128-MiB parts, but keep
        # num_i >= 2 so both v7x TensorCores get work (i is 'parallel').
        cands = [t for t in (512, 256, 128) if pl.cdiv(m, t) >= 2]
        return cands or [128]

    mode = None
    tm = tk = tn = need = None

    if _force_tiles is not None:
        tm, tk, tn = _force_tiles
        assert kp % tk == 0 and np_ % tn == 0, (_force_tiles, kp, np_)
        mode = "tiledN"
        num_k = kp // tk
        need = (2 * tm * tk * xsz + 2 * tk * tn * wsz + 2 * tn * bsz
                + 2 * tm * tn * xsz + tm * tn * 4 + num_k * tm * tk * xsz)

    # -------- full-N fast path: no j loop, no activation cache --------
    if mode is None:
        for tm_c in _tm_candidates():
            for tk_c in _divisor_tiles(kp):
                need_c = (2 * tm_c * tk_c * xsz      # x double-buffer
                          + 2 * tk_c * np_ * wsz     # weight double-buffer
                          + 2 * np_ * bsz            # bias double-buffer
                          + 2 * tm_c * np_ * xsz     # output double-buffer
                          + tm_c * np_ * 4)          # f32 accumulator
                if need_c <= budget:
                    mode, tm, tk, tn, need = "fullN", tm_c, tk_c, np_, need_c
                    break
            if mode is not None:
                break

    # -------- tiled-N fallback (very wide N only) --------
    if mode is None:
        tm_cands = [_round_up(m, 16)] if m < 256 else [256, 128, 64, 32, 16]
        for tm_c in tm_cands:
            for tk_c in _divisor_tiles(kp):
                for tn_c in _divisor_tiles(np_):
                    num_k = kp // tk_c
                    need_c = (2 * tm_c * tk_c * xsz + 2 * tk_c * tn_c * wsz
                              + 2 * tn_c * bsz + 2 * tm_c * tn_c * xsz
                              + tm_c * tn_c * 4
                              + num_k * tm_c * tk_c * xsz)   # activation cache
                    if need_c <= budget:
                        mode, tm, tk, tn, need = "tiledN", tm_c, tk_c, tn_c, need_c
                        break
                if mode is not None:
                    break
            if mode is not None:
                break
        if mode is None:
            # Last resort (pathological K): smallest tiles, fail loudly if OOM.
            mode, tm, tk, tn = "tiledN", 16, 128, 128
            num_k = kp // tk
            need = (2 * tm * tk * xsz + 2 * tk * tn * wsz + 2 * tn * bsz
                    + 2 * tm * tn * xsz + tm * tn * 4 + num_k * tm * tk * xsz)

    mp = _round_up(m, tm)
    num_i, num_j, num_k = mp // tm, np_ // tn, kp // tk

    # -------- pad x (only input padded per call) --------
    x2d = x.reshape(m, in_channels)
    if (mp, kp) != (m, in_channels):
        x2d = jnp.pad(x2d, ((0, mp - m), (0, kp - in_channels)))

    vmem_limit = min(int(0.90 * vmem_cap), max(32 * _MIB, 2 * need))

    # -------- cost estimate (actual traffic, MXU pass-aware flops) --------
    pass_factor = 1
    if jnp.dtype(x.dtype) == jnp.float32:
        if precision == jax.lax.Precision.HIGHEST:
            pass_factor = 6
        elif precision == jax.lax.Precision.HIGH:
            pass_factor = 3
    cost = pl.CostEstimate(
        flops=2 * mp * kp * np_ * pass_factor,
        transcendentals=2 * mp * kp,                 # exp + log1p per element
        bytes_accessed=(mp * kp * xsz                # x read ~once
                        + num_i * kp * np_ * wsz     # weight re-streamed per i
                        + num_i * np_ * bsz
                        + mp * np_ * xsz),
    )

    if mode == "fullN":
        kernel = functools.partial(_fullN_kernel, act_offset=act_offset,
                                   act_const=act_const, precision=precision)
        out = pl.pallas_call(
            kernel,
            out_shape=jax.ShapeDtypeStruct((mp, np_), out_dtype),
            grid_spec=pltpu.PrefetchScalarGridSpec(
                num_scalar_prefetch=0,
                grid=(num_i, num_k),
                in_specs=[
                    pl.BlockSpec((tm, tk), lambda i, k: (i, k)),      # x
                    pl.BlockSpec((tk, np_), lambda i, k: (k, 0)),     # weight_t
                    pl.BlockSpec((1, np_), lambda i, k: (0, 0)),      # bias
                ],
                out_specs=pl.BlockSpec((tm, np_), lambda i, k: (i, 0)),
                scratch_shapes=[pltpu.VMEM((tm, np_), jnp.float32)],  # f32 acc
            ),
            compiler_params=pltpu.CompilerParams(
                dimension_semantics=("parallel", "arbitrary"),
                vmem_limit_bytes=vmem_limit,
            ),
            cost_estimate=cost,
        )(x2d, weight_t, b2d)
    else:
        kernel = functools.partial(_tiledN_kernel, act_offset=act_offset,
                                   act_const=act_const, precision=precision)
        out = pl.pallas_call(
            kernel,
            out_shape=jax.ShapeDtypeStruct((mp, np_), out_dtype),
            grid_spec=pltpu.PrefetchScalarGridSpec(
                num_scalar_prefetch=0,
                grid=(num_i, num_j, num_k),
                in_specs=[
                    # x block index is PINNED to (i, 0) when j > 0: the kernel
                    # reads x only under @pl.when(j == 0) (it reuses the VMEM
                    # activation cache for j > 0), so freezing the block index
                    # suppresses the redundant HBM->VMEM x DMAs on those steps.
                    pl.BlockSpec((tm, tk),
                                 lambda i, j, k: (i, jnp.where(j == 0, k, 0))),
                    pl.BlockSpec((tk, tn), lambda i, j, k: (k, j)),   # weight_t
                    pl.BlockSpec((1, tn), lambda i, j, k: (0, j)),    # bias
                ],
                out_specs=pl.BlockSpec((tm, tn), lambda i, j, k: (i, j)),
                scratch_shapes=[
                    pltpu.VMEM((tm, tn), jnp.float32),          # f32 accumulator
                    pltpu.VMEM((num_k, tm, tk), x.dtype),       # activation cache
                ],
            ),
            compiler_params=pltpu.CompilerParams(
                # i is megacore-shardable; j must stay 'arbitrary' so the
                # per-core activation cache (filled at j==0) stays valid; k is
                # the reduction axis (accumulator resident across it).
                dimension_semantics=("parallel", "arbitrary", "arbitrary"),
                vmem_limit_bytes=vmem_limit,
            ),
            cost_estimate=cost,
        )(x2d, weight_t, b2d)

    out = out[:m, :out_channels]
    return out.reshape(*lead_shape, out_channels)


# ----------------------------------------------------------------------------
# Parameter init (ScaledLinear semantics) — pre-transposed AND pre-padded once.
# ----------------------------------------------------------------------------
def init_params(key, in_channels, out_channels, initial_scale=1.0,
                dtype=jnp.float32):
    """ScaledLinear init: nn.Linear default uniform(-1/sqrt(fan_in), ..) scaled
    by initial_scale; bias ~ uniform(-0.1*initial_scale, 0.1*initial_scale).
    Returns (weight_t, bias) with weight_t of shape (Kp, Np): transposed and
    zero-padded to 128-multiples ONCE here, so the forward never pays a
    per-call HBM transpose/pad of the weight."""
    kw, kb = jax.random.split(key)
    bound = 1.0 / math.sqrt(in_channels)
    weight = jax.random.uniform(kw, (out_channels, in_channels), jnp.float32,
                                minval=-bound, maxval=bound) * initial_scale
    bias = jax.random.uniform(kb, (out_channels,), jnp.float32,
                              minval=-0.1 * initial_scale,
                              maxval=0.1 * initial_scale)
    kp = _round_up(in_channels, 128)
    np_ = _round_up(out_channels, 128)
    weight_t = jnp.zeros((kp, np_), jnp.float32)
    weight_t = weight_t.at[:in_channels, :out_channels].set(weight.T)
    bias_p = jnp.zeros((np_,), jnp.float32).at[:out_channels].set(bias)
    return weight_t.astype(dtype), bias_p.astype(dtype)


def _reference(x, weight_t, bias, out_channels, activation: str = "SwooshL"):
    if activation == "SwooshL":
        offset, const = 4.0, 0.035
    else:
        offset, const = 1.0, 0.313261687
    in_channels = x.shape[-1]
    w = weight_t[:in_channels, :out_channels].astype(jnp.float32)
    b = bias[:out_channels].astype(jnp.float32)
    xf = x.astype(jnp.float32)
    act = jax.nn.softplus(xf - offset) - 0.08 * xf - const
    return (jnp.dot(act, w, precision=jax.lax.Precision.HIGHEST) + b
            ).astype(x.dtype)


if __name__ == "__main__":
    key = jax.random.PRNGKey(0)
    k_x1, k_p1, k_x2, k_p2 = jax.random.split(key, 4)

    # --- Test 1: full-N fast path, SwooshL, small channels (exercises K/N
    # padding: padded x columns give non-zero activation but hit zero-padded
    # weight rows, so the sliced result is unchanged). ---
    batch, seq, in_c, out_c = 2, 8, 32, 32
    x1 = jax.random.normal(k_x1, (batch, seq, in_c), jnp.float32)
    w1, b1 = init_params(k_p1, in_c, out_c, initial_scale=1.0)
    out1 = activation_dropout_and_linear(x1, w1, b1, activation="SwooshL",
                                         out_channels=out_c)
    out1 = jax.block_until_ready(out1)
    ref1 = _reference(x1, w1, b1, out_c, activation="SwooshL")
    assert out1.shape == (batch, seq, out_c), out1.shape
    err1 = float(jnp.max(jnp.abs(out1 - ref1)))
    assert jnp.allclose(out1, ref1, atol=1e-5, rtol=1e-5), err1

    # --- Test 2: tiled-N fallback path, SwooshR, forced small tiles so the
    # grid has multiple i/j/k steps (exercises the activation cache and the
    # pinned-x index map for j > 0). ---
    batch2, seq2, in_c2, out_c2 = 2, 24, 256, 256
    x2 = jax.random.normal(k_x2, (batch2, seq2, in_c2), jnp.float32)
    w2, b2 = init_params(k_p2, in_c2, out_c2, initial_scale=0.5)
    out2 = activation_dropout_and_linear(x2, w2, b2, activation="SwooshR",
                                         out_channels=out_c2,
                                         _force_tiles=(16, 128, 128))
    out2 = jax.block_until_ready(out2)
    ref2 = _reference(x2, w2, b2, out_c2, activation="SwooshR")
    assert out2.shape == (batch2, seq2, out_c2), out2.shape
    err2 = float(jnp.max(jnp.abs(out2 - ref2)))
    assert jnp.allclose(out2, ref2, atol=5e-5, rtol=5e-5), err2

    print("KERNEL_OK")
</pallas_src>

<mosaic_0001>
module attributes {stable_mosaic.version = 11 : i64} {
  func.func @_fullN_kernel(%arg0: i32, %arg1: i32, %arg2: memref<16x128xf32, #tpu.memory_space<vmem>>, %arg3: memref<128x128xf32, #tpu.memory_space<vmem>>, %arg4: memref<1x128xf32, #tpu.memory_space<vmem>>, %arg5: memref<16x128xf32, #tpu.memory_space<vmem>>, %arg6: memref<16x128xf32, #tpu.memory_space<vmem>>) attributes {dimension_semantics = [#tpu.dimension_semantics<parallel>, #tpu.dimension_semantics<arbitrary>], iteration_bounds = array<i64: 1, 1>, scalar_prefetch = 0 : i64, scratch_operands = 1 : i64, tpu.core_type = #tpu.core_type<tc>, window_params = [{transform_indices = @transform_0, window_bounds = array<i64: 16, 128>}, {transform_indices = @transform_1, window_bounds = array<i64: 128, 128>}, {pipeline_mode = #tpu.pipeline_mode<synchronous>, transform_indices = @transform_2, window_bounds = array<i64: 1, 128>}, {transform_indices = @transform_3, window_bounds = array<i64: 16, 128>}]} {
    %c0_i32 = arith.constant 0 : i32
    %0 = arith.cmpi eq, %arg1, %c0_i32 : i32
    %1 = arith.extui %0 : i1 to i32
    %c0_i32_0 = arith.constant 0 : i32
    %2 = arith.cmpi ne, %1, %c0_i32_0 : i32
    scf.if %2 {
      %cst_15 = arith.constant 0.000000e+00 : f32
      %26 = vector.broadcast %cst_15 : f32 to vector<16x128xf32>
      %c0_16 = arith.constant 0 : index
      %c0_17 = arith.constant 0 : index
      %27 = vector.load %arg6[%c0_16, %c0_17] : memref<16x128xf32, #tpu.memory_space<vmem>>, vector<16x128xf32>
      tpu.vector_store %arg6[%c0_16, %c0_17], %26 {strides = array<i32>} : memref<16x128xf32, #tpu.memory_space<vmem>>, vector<16x128xf32>,
    } else {
    }
    %c0 = arith.constant 0 : index
    %c0_1 = arith.constant 0 : index
    %3 = vector.load %arg2[%c0, %c0_1] : memref<16x128xf32, #tpu.memory_space<vmem>>, vector<16x128xf32>
    %cst = arith.constant 4.000000e+00 : f32
    %4 = vector.broadcast %cst : f32 to vector<16x128xf32>
    %5 = arith.subf %3, %4 : vector<16x128xf32>
    %cst_2 = arith.constant 3.000000e+01 : f32
    %6 = vector.broadcast %cst_2 : f32 to vector<16x128xf32>
    %7 = arith.cmpf ogt, %5, %6 : vector<16x128xf32>
    %cst_3 = arith.constant 3.000000e+01 : f32
    %8 = vector.broadcast %cst_3 : f32 to vector<16x128xf32>
    %9 = arith.minimumf %5, %8 : vector<16x128xf32>
    %10 = math.exp %9 : vector<16x128xf32>
    %11 = math.log1p %10 : vector<16x128xf32>
    %12 = arith.select %7, %5, %11 : vector<16x128xi1>, vector<16x128xf32>
    %cst_4 = arith.constant 8.000000e-02 : f32
    %13 = vector.broadcast %cst_4 : f32 to vector<16x128xf32>
    %14 = arith.mulf %13, %3 : vector<16x128xf32>
    %15 = arith.subf %12, %14 : vector<16x128xf32>
    %cst_5 = arith.constant 3.500000e-02 : f32
    %16 = vector.broadcast %cst_5 : f32 to vector<16x128xf32>
    %17 = arith.subf %15, %16 : vector<16x128xf32>
    %c0_6 = arith.constant 0 : index
    %c0_7 = arith.constant 0 : index
    %18 = vector.load %arg6[%c0_6, %c0_7] : memref<16x128xf32, #tpu.memory_space<vmem>>, vector<16x128xf32>
    %c0_8 = arith.constant 0 : index
    %c0_9 = arith.constant 0 : index
    %19 = vector.load %arg3[%c0_8, %c0_9] : memref<128x128xf32, #tpu.memory_space<vmem>>, vector<128x128xf32>
    %cst_10 = arith.constant dense<0.000000e+00> : vector<16x128xf32>
    %20 = tpu.matmul %17, %19, %cst_10 {dimension_numbers = #tpu.dot_dimension_numbers<[1], [0], [0], [1], [0, 0, 1, 1], [], []>, precision = #tpu.contract_precision<fp32>} : vector<16x128xf32>, vector<128x128xf32>, vector<16x128xf32> -> vector<16x128xf32>
    %21 = arith.addf %18, %20 : vector<16x128xf32>
    %c0_11 = arith.constant 0 : index
    %c0_12 = arith.constant 0 : index
    %22 = vector.load %arg6[%c0_11, %c0_12] : memref<16x128xf32, #tpu.memory_space<vmem>>, vector<16x128xf32>
    tpu.vector_store %arg6[%c0_11, %c0_12], %21 {strides = array<i32>} : memref<16x128xf32, #tpu.memory_space<vmem>>, vector<16x128xf32>,
    %c0_i32_13 = arith.constant 0 : i32
    %23 = arith.cmpi eq, %arg1, %c0_i32_13 : i32
    %24 = arith.extui %23 : i1 to i32
    %c0_i32_14 = arith.constant 0 : i32
    %25 = arith.cmpi ne, %24, %c0_i32_14 : i32
    scf.if %25 {
      %c0_15 = arith.constant 0 : index
      %c0_16 = arith.constant 0 : index
      %26 = vector.load %arg6[%c0_15, %c0_16] : memref<16x128xf32, #tpu.memory_space<vmem>>, vector<16x128xf32>
      %c0_17 = arith.constant 0 : index
      %c0_18 = arith.constant 0 : index
      %27 = vector.load %arg4[%c0_17, %c0_18] : memref<1x128xf32, #tpu.memory_space<vmem>>, vector<1x128xf32>
      %28 = vector.broadcast %27 : vector<1x128xf32> to vector<16x128xf32>
      %29 = arith.addf %26, %28 : vector<16x128xf32>
      %c0_19 = arith.constant 0 : index
      %c0_20 = arith.constant 0 : index
      %30 = vector.load %arg5[%c0_19, %c0_20] : memref<16x128xf32, #tpu.memory_space<vmem>>, vector<16x128xf32>
      tpu.vector_store %arg5[%c0_19, %c0_20], %29 {strides = array<i32>} : memref<16x128xf32, #tpu.memory_space<vmem>>, vector<16x128xf32>,
    } else {
    }
    return
  }
  func.func @transform_0(%arg0: i32, %arg1: i32) -> (i32, i32) {
    %c0_i32 = arith.constant 0 : i32
    return %arg0, %arg1 : i32, i32
  }
  func.func @transform_1(%arg0: i32, %arg1: i32) -> (i32, i32) {
    %c0_i32 = arith.constant 0 : i32
    %c0_i32_0 = arith.constant 0 : i32
    return %arg1, %c0_i32 : i32, i32
  }
  func.func @transform_2(%arg0: i32, %arg1: i32) -> (i32, i32) {
    %c0_i32 = arith.constant 0 : i32
    %c0_i32_0 = arith.constant 0 : i32
    %c0_i32_1 = arith.constant 0 : i32
    return %c0_i32, %c0_i32_0 : i32, i32
  }
  func.func @transform_3(%arg0: i32, %arg1: i32) -> (i32, i32) {
    %c0_i32 = arith.constant 0 : i32
    %c0_i32_0 = arith.constant 0 : i32
    return %arg0, %c0_i32 : i32, i32
  }
}

</mosaic_0001>

<bundles_post_ra>
// kernel: tpu_custom_call.1
= control target key start
LH: loop header
LB: loop body
LE: loop exit
PB: predicated region body
PF: predicated region fallthrough
CT: control target
= control target key end

     0   :  { %8 = vsyncpa [#allocation4], 0  ;;  %s1810_s0 = inlined_call_operand.hbm [shape: f32[16,128], index: 0, kind: input, shape index: {}]   ;;  %s1811_s1 = inlined_call_operand.hbm [shape: f32[128,128], index: 1, kind: input, shape index: {}]   ;;  %s1812_s2 = inlined_call_operand.vmem [shape: f32[1,128], index: 2, kind: input, shape index: {}]   ;;  %s1813_s3 = inlined_call_operand.hbm [shape: f32[16,128], index: 3, kind: output, shape index: {}]  }
   0x1   :  { %9 = vsyncpa [#allocation7], 0 }
   0x2   :  { %10 = vsyncpa [#allocation5], 0  ;;  %s1437_s12 = smov [#allocation3]   ;;  %s1365_s16 = scalar_lea.hbm %s1810_s0, 256 }
   0x3   :  { %s16_s13 = sshll.u32 %s1437_s12, 4  ;;  %p1366_p0 = scmp.ne.s32.totalorder %s1810_s0, %s1365_s16  ;;  %s17_s13 = int_to_ptr.vmem [resolvable:$true] %s16_s13 }
   0x4   :  { %p1369_p1 = scmp.lt.u32.totalorder %s1365_s16, %s1810_s0 }
   0x6   :  { %p1371_p2 = pnand %p1369_p1, %p1366_p0 }
   0x8   :  { %1374 = shalt.err (!%p1371_p2)
}
   0x9   :  { %s1375_s21 = scalar_lea.vmem %s17_s13, 256  ;;  %p1380_p4 = scmp.lt.s32.totalorder %s17_s13, %s17_s13 }
   0xa   :  { %p1376_p3 = scmp.ne.s32.totalorder %s17_s13, %s1375_s21  ;;  %p1381_p5 = scmp.lt.s32.totalorder %s1375_s21, %s1375_s21 }
   0xc   :  { %p1382_p6 = por %p1381_p5, %p1380_p4 }
   0xe   :  { %p1383_p7 = pnand %p1382_p6, %p1376_p3 }
  0x10   :  { %1386 = shalt.err (!%p1383_p7)
}
  0x11   :  { %s1438_s22 = smov 128   ;;  %s1439_s23 = smov 8  }
  0x12   :  { %22 = dma.hbm_to_vmem [thread:$0]  %s1810_s0, 256, %s17_s13, [#allocation4], %s1438_s22, %s1438_s22, %s1439_s23  }
  0x13   :  { %s1440_s26 = smov [#allocation6]   ;;  %s1387_s30 = scalar_lea.hbm %s1811_s1, 2048 }
  0x14   :  { %s28_s27 = sshll.u32 %s1440_s26, 4  ;;  %p1388_p8 = scmp.ne.s32.totalorder %s1811_s1, %s1387_s30  ;;  %s29_s27 = int_to_ptr.vmem [resolvable:$true] %s28_s27 }
  0x15   :  { %p1391_p9 = scmp.lt.u32.totalorder %s1387_s30, %s1811_s1 }
  0x17   :  { %p1393_p10 = pnand %p1391_p9, %p1388_p8 }
  0x19   :  { %1396 = shalt.err (!%p1393_p10)
}
  0x1a   :  { %s1397_s8 = scalar_lea.vmem %s29_s27, 2048  ;;  %p1402_p12 = scmp.lt.s32.totalorder %s29_s27, %s29_s27 }
  0x1b   :  { %p1398_p11 = scmp.ne.s32.totalorder %s29_s27, %s1397_s8  ;;  %p1403_p13 = scmp.lt.s32.totalorder %s1397_s8, %s1397_s8 }
  0x1d   :  { %p1404_p0 = por %p1403_p13, %p1402_p12 }
  0x1f   :  { %p1405_p1 = pnand %p1404_p0, %p1398_p11 }
  0x21   :  { %1408 = shalt.err (!%p1405_p1)
}
  0x22   :  { %34 = dma.hbm_to_vmem [thread:$0]  %s1811_s1, 2048, %s29_s27, [#allocation7], %s1438_s22, %s1438_s22, %s1439_s23  }
  0x23   :  { %1431 = dma.done.wait [#allocation4], 256  }
  0x24   :  { %1432 = vsyncadd [#allocation4], 4294967040 }
  0x25   :  { %1433 = dma.done.wait [#allocation7], 2048  }
  0x26   :  { %1434 = vsyncadd [#allocation7], 4294965248  ;;  %v89_v0 = vld [vmem:[#allocation6] sm:$0xff]  ;;  %v90_v1 = vld [vmem:[#allocation6 + $0x8] sm:$0xff]  ;;  %s1441_s11 = smov [#allocation8]  }
  0x27   :  { %v1492_v2 = vld [vmem:[#allocation6 + $0x10] sm:$0xff]  ;;  %v106_v3 = vand.u32 4294901760, %v89_v0  ;;  %v109_v4 = vand.u32 4294901760, %v90_v1  ;;  %v1494_v5 = vld [vmem:[#allocation6 + $0x18] sm:$0xff]  ;;  %v1497_v7 = vld [vmem:[#allocation6 + $0x20] sm:$0xff]  ;;  %s814_s12 = sshll.u32 %s1441_s11, 4  ;;  %s815_s12 = int_to_ptr.vmem [resolvable:$true] %s814_s12 }
  0x28   :  { %v112_v6 = vand.u32 4294901760, %v1492_v2  ;;  %v1499_v8 = vld [vmem:[#allocation6 + $0x28] sm:$0xff]  ;;  %v115_v9 = vand.u32 4294901760, %v1494_v5  ;;  %v118_v11 = vand.u32 4294901760, %v1497_v7  ;;  %v1512_v14 = vld [vmem:[#allocation6 + $0x30] sm:$0xff]  ;;  %v1514_v15 = vld [vmem:[#allocation6 + $0x38] sm:$0xff]  ;;  %p1414_p3 = scmp.lt.s32.totalorder %s815_s12, %s815_s12 }
  0x29   :  { %v1502_v10 = vpack.c.bf16 %v109_v4, %v106_v3  ;;  %v121_v12 = vand.u32 4294901760, %v1499_v8  ;;  %v1518_v16 = vld [vmem:[#allocation3] sm:$0xff]  ;;  %v1525_v18 = vld [vmem:[#allocation3 + $0x8] sm:$0xff]  ;;  %v124_v20 = vand.u32 4294901760, %v1512_v14  ;;  %v127_v21 = vand.u32 4294901760, %v1514_v15  ;;  %v1537_v22 = vld [vmem:[#allocation6 + $0x40] sm:$0xff] }
  0x2a   :  { %v1510_v13 = vpack.c.bf16 %v115_v9, %v112_v6  ;;  %v1523_v17 = vadd.f32 -4.0, %v1518_v16  ;;  %v1539_v23 = vld [vmem:[#allocation6 + $0x48] sm:$0xff]  ;;  %v1543_v25 = vadd.f32 -4.0, %v1525_v18  ;;  %v130_v28 = vand.u32 4294901760, %v1537_v22  ;;  %v1557_v30 = vld [vmem:[#allocation6 + $0x50] sm:$0xff]  ;;  %v1559_v31 = vld [vmem:[#allocation6 + $0x58] sm:$0xff] }
  0x2b   :  { %1247 = vmatprep.subr.bf16.mxu0 %v1502_v10  ;;  %1151 = vmatprep.subr.bf16.mxu1 %v1502_v10  ;;  %v1533_v19 = vpack.c.bf16 %v121_v12, %v118_v11  ;;  %v1553_v27 = vpack.c.bf16 %v127_v21, %v124_v20  ;;  %v133_v29 = vand.u32 4294901760, %v1539_v23  ;;  %v136_v34 = vand.u32 4294901760, %v1557_v30  ;;  %v1574_v37 = vld [vmem:[#allocation6 + $0x60] sm:$0xff]  ;;  %v1580_v40 = vld [vmem:[#allocation6 + $0x68] sm:$0xff]  ;;  %v1594_v44 = vld [vmem:[#allocation6 + $0x70] sm:$0xff]  ;;  %s1409_s13 = scalar_lea.vmem %s815_s12, 256 }
  0x2c   :  { %1249 = vmatpush3.bf16.msra.mxu0 %v1502_v10  ;;  %1153 = vmatpush3.bf16.msra.mxu1 %v1502_v10  ;;  %v55_v24 = vmin.f32 %v1523_v17, 30.0  ;;  %v56_v32 = vmin.f32 %v1543_v25, 30.0  ;;  %v139_v35 = vand.u32 4294901760, %v1559_v31  ;;  %v1576_v38 = vsub.f32 %v89_v0, %v106_v3  ;;  %v1596_v45 = vld [vmem:[#allocation6 + $0x78] sm:$0xff]  ;;  %p1410_p2 = scmp.ne.s32.totalorder %s815_s12, %s1409_s13  ;;  %p1415_p4 = scmp.lt.s32.totalorder %s1409_s13, %s1409_s13 }
  0x2d   :  { %1251 = vmatprep.subr.bf16.mxu0 %v1510_v13  ;;  %1155 = vmatprep.subr.bf16.mxu1 %v1510_v13  ;;  %v1572_v36 = vpack.c.bf16 %v133_v29, %v130_v28  ;;  %v1578_v39 = vsub.f32 %v90_v1, %v109_v4  ;;  %v142_v41 = vand.u32 4294901760, %v1574_v37  ;;  %v145_v43 = vand.u32 4294901760, %v1580_v40 }
  0x2e   :  { %v57_v26 = vmul.f32 1.442695, %v55_v24  ;;  %v59_v33 = vmul.f32 1.442695, %v56_v32  ;;  %v1591_v42 = vpack.c.bf16 %v139_v35, %v136_v34  ;;  %v209_v46 = vand.u32 4294901760, %v1576_v38  ;;  %p1416_p5 = por %p1415_p4, %p1414_p3 }
  0x2f   :  { %v216_v47 = vand.u32 4294901760, %v1578_v39  ;;  %v148_v49 = vand.u32 4294901760, %v1594_v44  ;;  %v151_v50 = vand.u32 4294901760, %v1596_v45  ;;  %v1610_v51 = vpack.c.bf16 %v145_v43, %v142_v41 }
  0x30   :  { %1253 = vmatpush3.bf16.msra.mxu0 %v1510_v13  ;;  %1157 = vmatpush3.bf16.msra.mxu1 %v1510_v13  ;;  %1357 = vpow2.f32 %v57_v26  ;;  %v210_v53 = vsub.f32 %v1576_v38, %v209_v46  ;;  %vm53_vm1 = vcmp.gt.f32.partialorder %v1523_v17, 30.0  ;;  %vm54_vm3 = vcmp.gt.f32.partialorder %v1543_v25, 30.0  ;;  %p1417_p6 = pnand %p1416_p5, %p1410_p2 }
  0x31   :  { %1255 = vmatprep.subr.bf16.mxu0 %v1533_v19  ;;  %1159 = vmatprep.subr.bf16.mxu1 %v1533_v19  ;;  %1359 = vpow2.f32 %v59_v33  ;;  %v217_v54 = vsub.f32 %v1578_v39, %v216_v47  ;;  %v1622_v58 = vpack.c.bf16 %v151_v50, %v148_v49  ;;  %v1278_v0 = vpack.c.bf16 %v216_v47, %v209_v46 }
  0x32   :  { %v211_v59 = vand.u32 4294901760, %v210_v53  ;;  %v81_v33 = vmul.f32 0.08, %v1518_v16  ;;  %v82_v53 = vmul.f32 0.08, %v1525_v18  ;;  %v1646_v16 = vsub.f32 %v1494_v5, %v115_v9 }
  0x33   :  { %v218_v60 = vand.u32 4294901760, %v217_v54  ;;  %v1651_v18 = vsub.f32 %v1497_v7, %v118_v11  ;;  %v1659_v5 = vsub.f32 %v1499_v8, %v121_v12  ;;  %v1667_v7 = vsub.f32 %v1512_v14, %v124_v20 }
  0x34   :  { %1257 = vmatpush3.bf16.msra.mxu0 %v1533_v19  ;;  %1161 = vmatpush3.bf16.msra.mxu1 %v1533_v19 }
  0x35   :  { %1259 = vmatprep.subr.bf16.mxu0 %v1553_v27  ;;  %1163 = vmatprep.subr.bf16.mxu1 %v1553_v27  ;;  %v1628_v1 = vpack.c.bf16 %v218_v60, %v211_v59  ;;  %v230_v60 = vand.u32 4294901760, %v1646_v16 }
  0x38   :  { %1261 = vmatpush3.bf16.msra.mxu0 %v1553_v27  ;;  %1165 = vmatpush3.bf16.msra.mxu1 %v1553_v27 }
  0x39   :  { %1263 = vmatprep.subr.bf16.mxu0 %v1572_v36  ;;  %1167 = vmatprep.subr.bf16.mxu1 %v1572_v36 }
  0x3a   :  { %v1358_v48 = vpop.eup %1357 }
  0x3b   :  { %v61_v52 = vadd.f32 1.0, %v1358_v48  ;;  %v1360_v55 = vpop.eup %1359  ;;  %v64_v56 = vmul.f32 -0.5, %v1358_v48  ;;  %v67_v63 = vand.u32 2147483647, %v1358_v48 }
  0x3c   :  { %1265 = vmatpush3.bf16.msra.mxu0 %v1572_v36  ;;  %1169 = vmatpush3.bf16.msra.mxu1 %v1572_v36  ;;  %v70_v57 = vadd.f32 1.0, %v1360_v55  ;;  %v73_v61 = vmul.f32 -0.5, %v1360_v55  ;;  %v76_v24 = vand.u32 2147483647, %v1360_v55 }
  0x3d   :  { %1267 = vmatprep.subr.bf16.mxu0 %v1591_v42  ;;  %1171 = vmatprep.subr.bf16.mxu1 %v1591_v42  ;;  %1361 = vlog2.f32 %v61_v52  ;;  %v65_v62 = vadd.f32 1.0, %v64_v56  ;;  %vm68_vm0 = vcmp.lt.f32.partialorder %v67_v63, 0.0004427343  ;;  %v231_v63 = vsub.f32 %v1646_v16, %v230_v60 }
  0x3e   :  { %1363 = vlog2.f32 %v70_v57  ;;  %v74_v3 = vadd.f32 1.0, %v73_v61  ;;  %vm77_vm2 = vcmp.lt.f32.partialorder %v76_v24, 0.0004427343  ;;  %v251_v24 = vand.u32 4294901760, %v1667_v7 }
  0x3f   :  { %v66_v4 = vmul.f32 %v1358_v48, %v65_v62  ;;  %v1639_v48 = vsub.f32 %v1492_v2, %v112_v6  ;;  %v237_v62 = vand.u32 4294901760, %v1651_v18 }
  0x40   :  { %1269 = vmatpush3.bf16.msra.mxu0 %v1591_v42  ;;  %1173 = vmatpush3.bf16.msra.mxu1 %v1591_v42  ;;  %v75_v46 = vmul.f32 %v1360_v55, %v74_v3  ;;  %v244_v3 = vand.u32 4294901760, %v1659_v5 }
  0x41   :  { %1271 = vmatprep.subr.bf16.mxu0 %v1610_v51  ;;  %1175 = vmatprep.subr.bf16.mxu1 %v1610_v51  ;;  %v238_v20 = vsub.f32 %v1651_v18, %v237_v62 }
  0x44   :  { %1273 = vmatpush3.bf16.msra.mxu0 %v1610_v51  ;;  %1177 = vmatpush3.bf16.msra.mxu1 %v1610_v51 }
  0x45   :  { %1275 = vmatprep.subr.bf16.mxu0 %v1622_v58  ;;  %1179 = vmatprep.subr.bf16.mxu1 %v1622_v58 }
  0x47   :  { %v1362_v26 = vpop.eup %1361 }
  0x48   :  { %1277 = vmatpush3.bf16.msra.mxu0 %v1622_v58  ;;  %1181 = vmatpush3.bf16.msra.mxu1 %v1622_v58  ;;  %v63_v32 = vmul.f32 0.6931472, %v1362_v26  ;;  %v1364_v47 = vpop.eup %1363 }
  0x49   :  { %1279 = vmatprep.subr.bf16.mxu0 %v1278_v0  ;;  %1183 = vmatprep.subr.bf16.mxu1 %v1628_v1  ;;  %v72_v56 = vmul.f32 0.6931472, %v1364_v47 }
  0x4a   :  { %v69_v52 = vsel %vm68_vm0, %v66_v4, %v63_v32 }
  0x4b   :  { %v79_v54 = vsel %vm53_vm1, %v1523_v17, %v69_v52  ;;  %v78_v57 = vsel %vm77_vm2, %v75_v46, %v72_v56  ;;  %v223_v17 = vand.u32 4294901760, %v1639_v48  ;;  %v232_v52 = vand.u32 4294901760, %v231_v63 }
  0x4c   :  { %v83_v55 = vsub.f32 %v79_v54, %v81_v33  ;;  %v80_v2 = vsel %vm54_vm3, %v1543_v25, %v78_v57  ;;  %v1675_v25 = vsub.f32 %v1514_v15, %v127_v21  ;;  %v1691_v15 = vsub.f32 %v1537_v22, %v130_v28 }
  0x4d   :  { %v84_v6 = vsub.f32 %v80_v2, %v82_v53  ;;  %v224_v12 = vsub.f32 %v1639_v48, %v223_v17  ;;  %v1282_v26 = vpack.c.bf16 %v230_v60, %v223_v17  ;;  %v1698_v33 = vsub.f32 %v1539_v23, %v133_v29 }
  0x4e   :  { %v829_v59 = vadd.f32 -0.035, %v83_v55  ;;  %v258_v32 = vand.u32 4294901760, %v1675_v25  ;;  %v245_v53 = vsub.f32 %v1659_v5, %v244_v3  ;;  %v239_v28 = vand.u32 4294901760, %v238_v20 }
  0x4f   :  { %v830_v61 = vadd.f32 -0.035, %v84_v6  ;;  %v225_v47 = vand.u32 4294901760, %v224_v12  ;;  %v252_v56 = vsub.f32 %v1667_v7, %v251_v24  ;;  %v265_v55 = vand.u32 4294901760, %v1691_v15 }
  0x50   :  { %v1661_v9 = vand.u32 4294901760, %v829_v59  ;;  %v259_v23 = vsub.f32 %v1675_v25, %v258_v32  ;;  %v272_v29 = vand.u32 4294901760, %v1698_v33  ;;  %v1710_v57 = vsub.f32 %v1557_v30, %v136_v34 }
  0x51   :  { %v1677_v8 = vand.u32 4294901760, %v830_v61  ;;  %v1186_v6 = vpack.c.bf16 %v232_v52, %v225_v47  ;;  %v1286_v17 = vpack.c.bf16 %v244_v3, %v237_v62  ;;  %v1290_v60 = vpack.c.bf16 %v258_v32, %v251_v24 }
  0x52   :  { %v1670_v11 = vsub.f32 %v829_v59, %v1661_v9  ;;  %v1715_v59 = vsub.f32 %v1559_v31, %v139_v35  ;;  %v266_v12 = vsub.f32 %v1691_v15, %v265_v55  ;;  %v260_v30 = vand.u32 4294901760, %v259_v23 }
  0x53   :  { %v1684_v14 = vsub.f32 %v830_v61, %v1677_v8  ;;  %v253_v61 = vand.u32 4294901760, %v252_v56  ;;  %v273_v34 = vsub.f32 %v1698_v33, %v272_v29  ;;  %v279_v31 = vand.u32 4294901760, %v1710_v57 }
  0x54   :  { %v188_v4 = vand.u32 4294901760, %v1670_v11  ;;  %v286_v35 = vand.u32 4294901760, %v1715_v59  ;;  %v1726_v63 = vsub.f32 %v1574_v37, %v142_v41  ;;  %v1294_v3 = vpack.c.bf16 %v272_v29, %v265_v55 }
  0x55   :  { %v198_v46 = vand.u32 4294901760, %v1684_v14  ;;  %v1194_v20 = vpack.c.bf16 %v260_v30, %v253_v61  ;;  %v274_v24 = vand.u32 4294901760, %v273_v34 }
  0x56   :  { %1077 = vmatprep.mubr.f32.mxu0 %v188_v4  ;;  %v189_v21 = vsub.f32 %v1670_v11, %v188_v4  ;;  %v267_v4 = vand.u32 4294901760, %v266_v12  ;;  %v293_v37 = vand.u32 4294901760, %v1726_v63 }
  0x57   :  { %1078 = vmatmul.mubr.f32.vlgmr.msra.gmra.mrb[0].mxu0 %v198_v46  ;;  %v199_v22 = vsub.f32 %v1684_v14, %v198_v46  ;;  %v1298_v46 = vpack.c.bf16 %v286_v35, %v279_v31 }
  0x58   :  { %v190_v54 = vand.u32 4294901760, %v189_v21  ;;  %1281 = vmatpush3.bf16.msra.mxu0 %v1278_v0  ;;  %v246_v0 = vand.u32 4294901760, %v245_v53  ;;  %1112 = vmatprep.mubr.f32.mxu0 %v1661_v9  ;;  %v280_v21 = vsub.f32 %v1710_v57, %v279_v31  ;;  %v1198_v32 = vpack.c.bf16 %v274_v24, %v267_v4 }
  0x59   :  { %1283 = vmatprep.subr.bf16.mxu0 %v1282_v26  ;;  %v200_v2 = vand.u32 4294901760, %v199_v22  ;;  %v294_v53 = vsub.f32 %v1726_v63, %v293_v37 }
  0x5a   :  { %972 = vmatprep.mubr.f32.mxu1 %v190_v54  ;;  %v1190_v62 = vpack.c.bf16 %v246_v0, %v239_v28  ;;  %v281_v47 = vand.u32 4294901760, %v280_v21  ;;  %v1214_v0 = vpack.c.bf16 %v1578_v39, %v1576_v38  ;;  %v1222_v38 = vpack.c.bf16 %v1659_v5, %v1651_v18 }
  0x5b   :  { %973 = vmatmul.mubr.f32.vlgmr.msra.gmra.mrb[0].mxu1 %v200_v2  ;;  %v295_v22 = vand.u32 4294901760, %v294_v53 }
  0x5c   :  { %1185 = vmatpush3.bf16.msra.mxu1 %v1628_v1  ;;  %1285 = vmatpush3.bf16.msra.mxu0 %v1282_v26  ;;  %v1731_v1 = vsub.f32 %v1580_v40, %v145_v43  ;;  %v287_v26 = vsub.f32 %v1715_v59, %v286_v35  ;;  %v1741_v40 = vsub.f32 %v1594_v44, %v148_v49 }
  0x5d   :  { %1187 = vmatprep.subr.bf16.mxu1 %v1186_v6  ;;  %1287 = vmatprep.subr.bf16.mxu0 %v1286_v17  ;;  %v1746_v43 = vsub.f32 %v1596_v45, %v151_v50 }
  0x5e   :  { %1007 = vmatprep.mubr.f32.mxu1 %v1661_v9  ;;  %v300_v41 = vand.u32 4294901760, %v1731_v1  ;;  %v288_v52 = vand.u32 4294901760, %v287_v26  ;;  %v307_v44 = vand.u32 4294901760, %v1741_v40 }
  0x5f   :  { %v314_v49 = vand.u32 4294901760, %v1746_v43 }
  0x60   :  { %1189 = vmatpush3.bf16.msra.mxu1 %v1186_v6  ;;  %1289 = vmatpush3.bf16.msra.mxu0 %v1286_v17  ;;  %v301_v54 = vsub.f32 %v1731_v1, %v300_v41  ;;  %v1202_v45 = vpack.c.bf16 %v288_v52, %v281_v47  ;;  %v1302_v50 = vpack.c.bf16 %v300_v41, %v293_v37 }
  0x61   :  { %1191 = vmatprep.subr.bf16.mxu1 %v1190_v62  ;;  %1291 = vmatprep.subr.bf16.mxu0 %v1290_v60  ;;  %v308_v56 = vsub.f32 %v1741_v40, %v307_v44  ;;  %v315_v55 = vsub.f32 %v1746_v43, %v314_v49  ;;  %v1306_v29 = vpack.c.bf16 %v314_v49, %v307_v44 }
  0x62   :  { %v302_v28 = vand.u32 4294901760, %v301_v54 }
  0x63   :  { %v309_v2 = vand.u32 4294901760, %v308_v56  ;;  %v316_v6 = vand.u32 4294901760, %v315_v55 }
  0x64   :  { %1193 = vmatpush3.bf16.msra.mxu1 %v1190_v62  ;;  %1293 = vmatpush3.bf16.msra.mxu0 %v1290_v60  ;;  %v1206_v23 = vpack.c.bf16 %v302_v28, %v295_v22  ;;  %v1218_v60 = vpack.c.bf16 %v1646_v16, %v1639_v48 }
  0x65   :  { %1195 = vmatprep.subr.bf16.mxu1 %v1194_v20  ;;  %1295 = vmatprep.subr.bf16.mxu0 %v1294_v3  ;;  %v1210_v17 = vpack.c.bf16 %v316_v6, %v309_v2 }
  0x68   :  { %1197 = vmatpush3.bf16.msra.mxu1 %v1194_v20  ;;  %1297 = vmatpush3.bf16.msra.mxu0 %v1294_v3 }
  0x69   :  { %1199 = vmatprep.subr.bf16.mxu1 %v1198_v32  ;;  %1299 = vmatprep.subr.bf16.mxu0 %v1298_v46 }
  0x6c   :  { %1201 = vmatpush3.bf16.msra.mxu1 %v1198_v32  ;;  %1301 = vmatpush3.bf16.msra.mxu0 %v1298_v46 }
  0x6d   :  { %1203 = vmatprep.subr.bf16.mxu1 %v1202_v45  ;;  %1303 = vmatprep.subr.bf16.mxu0 %v1302_v50 }
  0x70   :  { %1205 = vmatpush3.bf16.msra.mxu1 %v1202_v45  ;;  %1305 = vmatpush3.bf16.msra.mxu0 %v1302_v50 }
  0x71   :  { %1207 = vmatprep.subr.bf16.mxu1 %v1206_v23  ;;  %1307 = vmatprep.subr.bf16.mxu0 %v1306_v29 }
  0x74   :  { %1209 = vmatpush3.bf16.msra.mxu1 %v1206_v23  ;;  %1309 = vmatpush3.bf16.msra.mxu0 %v1306_v29 }
  0x75   :  { %1211 = vmatprep.subr.bf16.mxu1 %v1210_v17  ;;  %1311 = vmatprep.subr.bf16.mxu0 %v1502_v10 }
  0x77   :  { %1113 = vmatmul.mubr.f32.vlgmr.msra.gmra.mrb[0].mxu0 %v1677_v8 }
  0x78   :  { %1213 = vmatpush3.bf16.msra.mxu1 %v1210_v17  ;;  %1313 = vmatpush3.bf16.msra.mxu0 %v1502_v10  ;;  %v1226_v10 = vpack.c.bf16 %v1675_v25, %v1667_v7 }
  0x79   :  { %1215 = vmatprep.subr.bf16.mxu1 %v1214_v0  ;;  %1315 = vmatprep.subr.bf16.mxu0 %v1510_v13 }
  0x7a   :  { %1147 = vmatprep.mubr.f32.mxu0 %v1661_v9 }
  0x7b   :  { %1008 = vmatmul.mubr.f32.vlgmr.msra.gmra.mrb[0].mxu1 %v1677_v8 }
  0x7c   :  { %1217 = vmatpush3.bf16.msra.mxu1 %v1214_v0  ;;  %1317 = vmatpush3.bf16.msra.mxu0 %v1510_v13  ;;  %v1230_v13 = vpack.c.bf16 %v1698_v33, %v1691_v15 }
  0x7d   :  { %1219 = vmatprep.subr.bf16.mxu1 %v1218_v60  ;;  %1319 = vmatprep.subr.bf16.mxu0 %v1533_v19 }
  0x7e   :  { %1042 = vmatprep.mubr.f32.mxu1 %v1670_v11 }
  0x80   :  { %1221 = vmatpush3.bf16.msra.mxu1 %v1218_v60  ;;  %1321 = vmatpush3.bf16.msra.mxu0 %v1533_v19  ;;  %v1234_v19 = vpack.c.bf16 %v1715_v59, %v1710_v57 }
  0x81   :  { %1223 = vmatprep.subr.bf16.mxu1 %v1222_v38  ;;  %1323 = vmatprep.subr.bf16.mxu0 %v1553_v27 }
  0x84   :  { %1225 = vmatpush3.bf16.msra.mxu1 %v1222_v38  ;;  %1325 = vmatpush3.bf16.msra.mxu0 %v1553_v27  ;;  %v1238_v27 = vpack.c.bf16 %v1731_v1, %v1726_v63 }
  0x85   :  { %1227 = vmatprep.subr.bf16.mxu1 %v1226_v10  ;;  %1327 = vmatprep.subr.bf16.mxu0 %v1572_v36 }
  0x88   :  { %1229 = vmatpush3.bf16.msra.mxu1 %v1226_v10  ;;  %1329 = vmatpush3.bf16.msra.mxu0 %v1572_v36  ;;  %v1242_v36 = vpack.c.bf16 %v1746_v43, %v1741_v40 }
  0x89   :  { %1231 = vmatprep.subr.bf16.mxu1 %v1230_v13  ;;  %1331 = vmatprep.subr.bf16.mxu0 %v1591_v42 }
  0x8c   :  { %1233 = vmatpush3.bf16.msra.mxu1 %v1230_v13  ;;  %1333 = vmatpush3.bf16.msra.mxu0 %v1591_v42 }
  0x8d   :  { %1235 = vmatprep.subr.bf16.mxu1 %v1234_v19  ;;  %1335 = vmatprep.subr.bf16.mxu0 %v1610_v51 }
  0x90   :  { %1237 = vmatpush3.bf16.msra.mxu1 %v1234_v19  ;;  %1337 = vmatpush3.bf16.msra.mxu0 %v1610_v51  ;;  %v831_v51 = vld [vmem:[%s1812_s2] ss:$0 sm:$0xff] }
  0x91   :  { %1239 = vmatprep.subr.bf16.mxu1 %v1238_v27  ;;  %1339 = vmatprep.subr.bf16.mxu0 %v1622_v58 }
  0x94   :  { %1241 = vmatpush3.bf16.msra.mxu1 %v1238_v27  ;;  %1341 = vmatpush3.bf16.msra.mxu0 %v1622_v58 }
  0x95   :  { %1243 = vmatprep.subr.bf16.mxu1 %v1242_v36 }
  0x97   :  { %1148 = vmatmul.mubr.f32.vlgmr.msra.gmra.mrb[0].mxu0 %v1677_v8 }
  0x98   :  { %1245 = vmatpush3.bf16.msra.mxu1 %v1242_v36 }
  0x9b   :  { %1043 = vmatmul.mubr.f32.vlgmr.msra.gmra.mrb[0].mxu1 %v1684_v14 }
 0x16a   :  { %v1149_v39 = vpop.f32.mrb[0].mxu0 }
 0x16b   :  { %v779_v42 = vpop.f32.mrb[1].mxu0 }
 0x16e   :  { %v1044_v48 = vpop.f32.mrb[0].mxu1 }
 0x16f   :  { %v1342_v16 = vadd.f32 %v1149_v39, %v1044_v48  ;;  %v463_v18 = vpop.f32.mrb[1].mxu1 }
 0x170   :  { %v1343_v5 = vadd.f32 %v779_v42, %v463_v18 }
 0x171   :  { %v806_v9 = vadd.f32 %v1342_v16, %v831_v51 }
 0x172   :  { %v805_v58 = vadd.f32 %v1343_v5, %v831_v51 }
 0x173   :  { %808 = vst [vmem:[#allocation8 + $0x8] sm:$0xff] %v806_v9 }
 0x174   :  { %807 = vst [vmem:[#allocation8] sm:$0xff] %v805_v58 }
 0x175   :  { %1420 = shalt.err (!%p1417_p6)
}
 0x176   :  { %s1421_s2 = scalar_lea.hbm %s1813_s3, 256 }
 0x177   :  { %p1422_p7 = scmp.ne.s32.totalorder %s1813_s3, %s1421_s2  ;;  %p1425_p8 = scmp.lt.u32.totalorder %s1421_s2, %s1813_s3 }
 0x179   :  { %p1427_p9 = pnand %p1425_p8, %p1422_p7 }
 0x17b   :  { %1430 = shalt.err (!%p1427_p9)
}
 0x17c   :  { %820 = dma.vmem_to_hbm [thread:$0]  %s815_s12, 256, %s1813_s3, [#allocation5], %s1438_s22, %s1438_s22, %s1439_s23  }
 0x17d   :  { %1435 = dma.done.wait [#allocation5], 256  }
 0x17e   :  { %1436 = vsyncadd [#allocation5], 4294967040 }
 0x17f   :  { %824 = vsyncpa [#allocation4], 1 }
 0x180   :  { %825 = vsyncpa [#allocation7], 1 }
 0x181   :  { %826 = vsyncpa [#allocation5], 1 }

</bundles_post_ra>
